<compile_context>
chip_gen: v7x
topology: tpu7x:2x2x1
jax: 0.10.0
libtpu: 0.0.40
codegen_flags: <defaults>
</compile_context>

<pallas_src>
import jax
import jax.numpy as jnp
from jax import lax
from jax.experimental import pallas as pl
from jax.experimental.pallas import tpu as pltpu


# --------------------------------------------------------------------------- #
# helpers
# --------------------------------------------------------------------------- #
def _round_up(x, m):
    return ((x + m - 1) // m) * m


def _cdiv(a, b):
    return -(-a // b)


def _pick_tk(d_ff, max_tk=512):
    """Largest divisor of d_ff that is a multiple of 256 (preferred: MXU width on
    v6e/v7x) or 128, capped at max_tk; else the full d_ff (small toy shapes)."""
    for align in (256, 128):
        cand = min(max_tk, d_ff)
        cand -= cand % align
        while cand >= align:
            if d_ff % cand == 0:
                return cand
            cand -= align
    return d_ff


def _vmem_limit_bytes():
    """Per-generation VMEM limit (~75% of physical), conservative fallback."""
    cap = None
    try:
        cap = getattr(pltpu.get_tpu_info(), "vmem_capacity_bytes", None)
    except Exception:
        cap = None
    if not cap:
        cap = 64 * 1024 * 1024      # v7x-sized fallback: safe on every generation
    return int(cap) * 3 // 4


def _stream_footprint(tm, tk, d_model, x_b, c_b, o_b, use_acc):
    f = 2 * tm * d_model * x_b            # x tile (double-buffered)
    f += 2 * d_model * tk * c_b           # W1 slab
    f += 2 * tk * 4                       # b1 slab
    f += 2 * tk * d_model * c_b           # W2 slab
    f += 2 * d_model * 4                  # b2
    f += 2 * tm * d_model * o_b           # out tile
    if use_acc:
        f += tm * d_model * 4             # f32 accumulator scratch
    f += tm * tk * (4 + c_b)              # ReLU intermediate (f32 + cast copy)
    return f


def _resident_footprint(tm, tk, d_model, d_ff, x_b, c_b, o_b):
    f = 2 * tm * d_model * x_b            # x tile
    f += 2 * d_model * d_ff * c_b         # W1 (assume double-buffered)
    f += 2 * d_ff * 4                     # b1
    f += 2 * d_ff * d_model * c_b         # W2
    f += 2 * d_model * 4                  # b2
    f += 2 * tm * d_model * o_b           # out tile
    f += tm * d_model * 4                 # f32 accumulator (loop carry)
    f += tm * tk * (4 + c_b)              # ReLU intermediate
    return f


# --------------------------------------------------------------------------- #
# kernels
# --------------------------------------------------------------------------- #
def _stream_body(x_ref, w1_ref, b1_ref, w2_ref, b2_ref, o_ref, acc_ref,
                 compute_dtype):
    # x_ref : (tm, d_model)      w1_ref: (d_model, tk)   b1_ref: (1, tk)
    # w2_ref: (tk, d_model)      b2_ref: (1, d_model)
    # o_ref : (tm, d_model)      acc_ref: f32 (tm, d_model) (may alias o_ref)
    k = pl.program_id(1)

    @pl.when(k == 0)
    def _():
        acc_ref[...] = jnp.zeros_like(acc_ref)

    x = x_ref[...].astype(compute_dtype)        # in-kernel cast; x stays f32 in HBM
    h = jnp.dot(x, w1_ref[...], preferred_element_type=jnp.float32)
    h = jnp.maximum(h + b1_ref[...], 0.0)
    # dropout: identity (eval mode)
    acc_ref[...] += jnp.dot(h.astype(compute_dtype), w2_ref[...],
                            preferred_element_type=jnp.float32)

    @pl.when(k == pl.num_programs(1) - 1)
    def _():
        o_ref[...] = (acc_ref[...] + b2_ref[...]).astype(o_ref.dtype)


def _make_stream_kernel(compute_dtype, use_scratch_acc):
    if use_scratch_acc:
        def kernel(x_ref, w1_ref, b1_ref, w2_ref, b2_ref, o_ref, acc_ref):
            _stream_body(x_ref, w1_ref, b1_ref, w2_ref, b2_ref, o_ref, acc_ref,
                         compute_dtype)
    else:
        # f32 output: accumulate directly into the resident output block.
        def kernel(x_ref, w1_ref, b1_ref, w2_ref, b2_ref, o_ref):
            _stream_body(x_ref, w1_ref, b1_ref, w2_ref, b2_ref, o_ref, o_ref,
                         compute_dtype)
    return kernel


def _make_resident_kernel(compute_dtype, tk, n_k):
    def kernel(x_ref, w1_ref, b1_ref, w2_ref, b2_ref, o_ref):
        # Weights are whole (constant index_map) -> loaded from HBM only once.
        x = x_ref[...].astype(compute_dtype)

        if n_k == 1:
            h = jnp.dot(x, w1_ref[...], preferred_element_type=jnp.float32)
            h = jnp.maximum(h + b1_ref[...], 0.0)
            acc = jnp.dot(h.astype(compute_dtype), w2_ref[...],
                          preferred_element_type=jnp.float32)
        else:
            def body(j, acc):
                off = j * tk
                if tk % 128 == 0:
                    off = pl.multiple_of(off, 128)
                h = jnp.dot(x, w1_ref[:, pl.ds(off, tk)],
                            preferred_element_type=jnp.float32)
                h = jnp.maximum(h + b1_ref[:, pl.ds(off, tk)], 0.0)
                return acc + jnp.dot(h.astype(compute_dtype),
                                     w2_ref[pl.ds(off, tk), :],
                                     preferred_element_type=jnp.float32)

            acc = lax.fori_loop(
                0, n_k, body,
                jnp.zeros((x.shape[0], o_ref.shape[-1]), jnp.float32))

        # dropout: identity (eval mode)
        o_ref[...] = (acc + b2_ref[...]).astype(o_ref.dtype)

    return kernel


# --------------------------------------------------------------------------- #
# wrapper
# --------------------------------------------------------------------------- #
def positional_feed_forward(x, w1, b1, w2, b2, *, tm=512, max_tk=512,
                            compute_dtype=jnp.bfloat16, weight_resident=None):
    """Position-wise FFN:  y = relu(x @ W1 + b1) @ W2 + b2  (dropout = identity).

    x : [B, S, d_model]
    w1: [d_model, d_ff]   b1: [d_ff]      (fc1, (in, out) layout)
    w2: [d_ff, d_model]   b2: [d_model]   (fc2, (in, out) layout)
    compute_dtype: MXU dtype for the two GEMMs (default bf16 -- recommended on
        all generations). Biases and the accumulator stay f32.
    weight_resident: None = auto (hold W1/W2 in VMEM when they fit the
        per-generation budget); True/False to force.
    """
    B, S, d_model = x.shape
    d_ff = w1.shape[1]
    out_dtype = x.dtype
    compute_dtype = jnp.dtype(compute_dtype)

    # One-time weight cast (callers should ideally cache bf16 weights themselves).
    if w1.dtype != compute_dtype:
        w1 = w1.astype(compute_dtype)
    if w2.dtype != compute_dtype:
        w2 = w2.astype(compute_dtype)
    b1_2d = b1.reshape(1, d_ff).astype(jnp.float32)
    b2_2d = b2.reshape(1, d_model).astype(jnp.float32)

    x_b = jnp.dtype(x.dtype).itemsize
    c_b = compute_dtype.itemsize
    o_b = jnp.dtype(out_dtype).itemsize

    M = B * S
    x2d = x.reshape(M, d_model)                 # no wrapper-side cast / pad of x

    # Row-tile alignment: 16 for 16-bit activations/outputs, else 8.
    row_align = 16 if min(x_b, o_b) < 4 else 8
    min_tm = row_align
    tm = max(min_tm, min(int(tm), _round_up(M, row_align)))
    tm = _round_up(tm, row_align)
    tk = _pick_tk(d_ff, max_tk)

    limit = _vmem_limit_bytes()
    budget = int(limit * 0.9)                   # headroom for compiler scratch
    use_scratch_acc = jnp.dtype(out_dtype) != jnp.dtype(jnp.float32)

    def shrink_tm(t):
        return max(min_tm, _round_up(t // 2, row_align))

    # ---- choose weight-resident vs. K-streamed, fit tiles to the VMEM budget --
    tm0 = tm
    resident = weight_resident
    if resident is None:
        resident = (4 * d_model * d_ff * c_b) <= budget * 3 // 5

    if resident:
        while (tm > min_tm and
               _resident_footprint(tm, tk, d_model, d_ff, x_b, c_b, o_b) > budget):
            tm = shrink_tm(tm)
        if (_resident_footprint(tm, tk, d_model, d_ff, x_b, c_b, o_b) > budget
                and weight_resident is None):
            resident = False                    # auto-chosen but does not fit
            tm = tm0

    if not resident:
        while _stream_footprint(tm, tk, d_model, x_b, c_b, o_b,
                                use_scratch_acc) > budget:
            if tm > max(min_tm, 128):
                tm = shrink_tm(tm)
            elif tk > 128 and d_ff % 128 == 0:
                tk = _pick_tk(d_ff, max(128, tk // 2))
            elif tm > min_tm:
                tm = shrink_tm(tm)
            else:
                break                           # best effort for pathological shapes

    # ---- make sure the parallel row axis has >=2 tiles (v7x megacore) ---------
    if _cdiv(M, tm) < 2 and M > min_tm:
        tm = max(min_tm, min(tm, _round_up(_cdiv(M, 2), row_align)))

    grid_i = _cdiv(M, tm)
    compiler_params = pltpu.CompilerParams(
        dimension_semantics=(("parallel",) if resident
                             else ("parallel", "arbitrary")),
        vmem_limit_bytes=limit,
    )

    if resident:
        n_k = d_ff // tk
        kernel = _make_resident_kernel(compute_dtype, tk, n_k)
        grid_spec = pltpu.PrefetchScalarGridSpec(
            num_scalar_prefetch=0,
            grid=(grid_i,),
            in_specs=[
                pl.BlockSpec((tm, d_model),   lambda i: (i, 0)),   # x row tile
                pl.BlockSpec((d_model, d_ff), lambda i: (0, 0)),   # W1 (resident)
                pl.BlockSpec((1, d_ff),       lambda i: (0, 0)),   # b1
                pl.BlockSpec((d_ff, d_model), lambda i: (0, 0)),   # W2 (resident)
                pl.BlockSpec((1, d_model),    lambda i: (0, 0)),   # b2
            ],
            out_specs=pl.BlockSpec((tm, d_model), lambda i: (i, 0)),
        )
    else:
        kernel = _make_stream_kernel(compute_dtype, use_scratch_acc)
        grid_spec = pltpu.PrefetchScalarGridSpec(
            num_scalar_prefetch=0,
            grid=(grid_i, d_ff // tk),
            in_specs=[
                pl.BlockSpec((tm, d_model), lambda i, k: (i, 0)),   # x row tile
                pl.BlockSpec((d_model, tk), lambda i, k: (0, k)),   # W1 slab
                pl.BlockSpec((1, tk),       lambda i, k: (0, k)),   # b1 slab
                pl.BlockSpec((tk, d_model), lambda i, k: (k, 0)),   # W2 slab
                pl.BlockSpec((1, d_model),  lambda i, k: (0, 0)),   # b2
            ],
            out_specs=pl.BlockSpec((tm, d_model), lambda i, k: (i, 0)),
            scratch_shapes=([pltpu.VMEM((tm, d_model), jnp.float32)]
                            if use_scratch_acc else []),
        )

    out2d = pl.pallas_call(
        kernel,
        out_shape=jax.ShapeDtypeStruct((M, d_model), out_dtype),
        grid_spec=grid_spec,
        compiler_params=compiler_params,
    )(x2d, w1, b1_2d, w2, b2_2d)

    return out2d.reshape(B, S, d_model)


# --------------------------------------------------------------------------- #
# self-test
# --------------------------------------------------------------------------- #
if __name__ == "__main__":
    batch, seq, d_model, d_ff = 2, 8, 32, 64

    key = jax.random.PRNGKey(0)
    kx, kx2, kw1, kb1, kw2, kb2 = jax.random.split(key, 6)

    x = jax.random.normal(kx, (batch, seq, d_model), dtype=jnp.float32)

    # PyTorch nn.Linear parameter shapes:
    #   fc1.weight: (d_ff, d_model), fc1.bias: (d_ff,)
    #   fc2.weight: (d_model, d_ff), fc2.bias: (d_model,)
    lim1 = 1.0 / d_model ** 0.5
    lim2 = 1.0 / d_ff ** 0.5
    fc1_w = jax.random.uniform(kw1, (d_ff, d_model), jnp.float32, -lim1, lim1)
    fc1_b = jax.random.uniform(kb1, (d_ff,), jnp.float32, -lim1, lim1)
    fc2_w = jax.random.uniform(kw2, (d_model, d_ff), jnp.float32, -lim2, lim2)
    fc2_b = jax.random.uniform(kb2, (d_model,), jnp.float32, -lim2, lim2)

    # Kernel takes weights in (in_features, out_features) layout: transpose.
    w1, w2 = fc1_w.T, fc2_w.T

    def ref_ffn(xx, w1m, b1v, w2m, b2v):
        with jax.default_matmul_precision("highest"):
            return jnp.maximum(xx @ w1m + b1v, 0.0) @ w2m + b2v

    ref = ref_ffn(x, w1, fc1_b, w2, fc2_b)

    # 1) f32 compute path, auto weight-resident.
    out = jax.block_until_ready(
        positional_feed_forward(x, w1, fc1_b, w2, fc2_b,
                                compute_dtype=jnp.float32))
    assert out.shape == (batch, seq, d_model)
    assert jnp.allclose(out, ref, atol=1e-2, rtol=1e-2)

    # 2) default bf16 compute path (recommended): looser tolerance vs f32 ref.
    out_bf = jax.block_until_ready(
        positional_feed_forward(x, w1, fc1_b, w2, fc2_b))
    assert jnp.allclose(out_bf, ref, atol=5e-2, rtol=5e-2)

    # 3) forced K-streaming path, f32, ragged row count (M=24, tm=16).
    x2 = jax.random.normal(kx2, (3, seq, d_model), dtype=jnp.float32)
    out2 = jax.block_until_ready(
        positional_feed_forward(x2, w1, fc1_b, w2, fc2_b,
                                compute_dtype=jnp.float32,
                                weight_resident=False, tm=16))
    assert jnp.allclose(out2, ref_ffn(x2, w1, fc1_b, w2, fc2_b),
                        atol=1e-2, rtol=1e-2)

    # 4) bf16 activations/output: exercises the scratch-accumulator stream path.
    xb = x.astype(jnp.bfloat16)
    out3 = jax.block_until_ready(
        positional_feed_forward(xb, w1, fc1_b, w2, fc2_b,
                                weight_resident=False))
    assert out3.dtype == jnp.bfloat16
    assert jnp.allclose(out3.astype(jnp.float32), ref, atol=7e-2, rtol=7e-2)

    # 5) resident path with in-kernel d_ff tiling (n_k > 1): d_ff=256, max_tk=128.
    d_ff2 = 256
    kw3, kb3, kw4, kb4 = jax.random.split(kb2, 4)
    lim3 = 1.0 / d_ff2 ** 0.5
    g1_w = jax.random.uniform(kw3, (d_ff2, d_model), jnp.float32, -lim1, lim1)
    g1_b = jax.random.uniform(kb3, (d_ff2,), jnp.float32, -lim1, lim1)
    g2_w = jax.random.uniform(kw4, (d_model, d_ff2), jnp.float32, -lim3, lim3)
    g2_b = jax.random.uniform(kb4, (d_model,), jnp.float32, -lim3, lim3)
    out5 = jax.block_until_ready(
        positional_feed_forward(x, g1_w.T, g1_b, g2_w.T, g2_b,
                                compute_dtype=jnp.float32, max_tk=128,
                                weight_resident=True))
    assert jnp.allclose(out5, ref_ffn(x, g1_w.T, g1_b, g2_w.T, g2_b),
                        atol=1e-2, rtol=1e-2)

    print("KERNEL_OK")
</pallas_src>

<mosaic_0001>
module attributes {stable_mosaic.version = 11 : i64} {
  func.func @kernel(%arg0: i32, %arg1: memref<8x32xf32, #tpu.memory_space<vmem>>, %arg2: memref<32x64xf32, #tpu.memory_space<vmem>>, %arg3: memref<1x64xf32, #tpu.memory_space<vmem>>, %arg4: memref<64x32xf32, #tpu.memory_space<vmem>>, %arg5: memref<1x32xf32, #tpu.memory_space<vmem>>, %arg6: memref<8x32xf32, #tpu.memory_space<vmem>>) attributes {dimension_semantics = [#tpu.dimension_semantics<parallel>], iteration_bounds = array<i64: 2>, scalar_prefetch = 0 : i64, scratch_operands = 0 : i64, tpu.core_type = #tpu.core_type<tc>, window_params = [{transform_indices = @transform_0, window_bounds = array<i64: 8, 32>}, {pipeline_mode = #tpu.pipeline_mode<synchronous>, transform_indices = @transform_1, window_bounds = array<i64: 32, 64>}, {pipeline_mode = #tpu.pipeline_mode<synchronous>, transform_indices = @transform_2, window_bounds = array<i64: 1, 64>}, {pipeline_mode = #tpu.pipeline_mode<synchronous>, transform_indices = @transform_3, window_bounds = array<i64: 64, 32>}, {pipeline_mode = #tpu.pipeline_mode<synchronous>, transform_indices = @transform_4, window_bounds = array<i64: 1, 32>}, {transform_indices = @transform_5, window_bounds = array<i64: 8, 32>}]} {
    %c0 = arith.constant 0 : index
    %c0_0 = arith.constant 0 : index
    %0 = vector.load %arg1[%c0, %c0_0] : memref<8x32xf32, #tpu.memory_space<vmem>>, vector<8x32xf32>
    %c0_1 = arith.constant 0 : index
    %c0_2 = arith.constant 0 : index
    %1 = vector.load %arg2[%c0_1, %c0_2] : memref<32x64xf32, #tpu.memory_space<vmem>>, vector<32x64xf32>
    %cst = arith.constant dense<0.000000e+00> : vector<8x64xf32>
    %2 = tpu.matmul %0, %1, %cst {dimension_numbers = #tpu.dot_dimension_numbers<[1], [0], [0], [1], [0, 0, 1, 1], [], []>} : vector<8x32xf32>, vector<32x64xf32>, vector<8x64xf32> -> vector<8x64xf32>
    %c0_3 = arith.constant 0 : index
    %c0_4 = arith.constant 0 : index
    %3 = vector.load %arg3[%c0_3, %c0_4] : memref<1x64xf32, #tpu.memory_space<vmem>>, vector<1x64xf32>
    %4 = vector.broadcast %3 : vector<1x64xf32> to vector<8x64xf32>
    %5 = arith.addf %2, %4 : vector<8x64xf32>
    %cst_5 = arith.constant 0.000000e+00 : f32
    %6 = vector.broadcast %cst_5 : f32 to vector<8x64xf32>
    %7 = arith.maximumf %5, %6 : vector<8x64xf32>
    %c0_6 = arith.constant 0 : index
    %c0_7 = arith.constant 0 : index
    %8 = vector.load %arg4[%c0_6, %c0_7] : memref<64x32xf32, #tpu.memory_space<vmem>>, vector<64x32xf32>
    %cst_8 = arith.constant dense<0.000000e+00> : vector<8x32xf32>
    %9 = tpu.matmul %7, %8, %cst_8 {dimension_numbers = #tpu.dot_dimension_numbers<[1], [0], [0], [1], [0, 0, 1, 1], [], []>} : vector<8x64xf32>, vector<64x32xf32>, vector<8x32xf32> -> vector<8x32xf32>
    %c0_9 = arith.constant 0 : index
    %c0_10 = arith.constant 0 : index
    %10 = vector.load %arg5[%c0_9, %c0_10] : memref<1x32xf32, #tpu.memory_space<vmem>>, vector<1x32xf32>
    %11 = vector.broadcast %10 : vector<1x32xf32> to vector<8x32xf32>
    %12 = arith.addf %9, %11 : vector<8x32xf32>
    %c0_11 = arith.constant 0 : index
    %c0_12 = arith.constant 0 : index
    %13 = vector.load %arg6[%c0_11, %c0_12] : memref<8x32xf32, #tpu.memory_space<vmem>>, vector<8x32xf32>
    tpu.vector_store %arg6[%c0_11, %c0_12], %12 {strides = array<i32>} : memref<8x32xf32, #tpu.memory_space<vmem>>, vector<8x32xf32>,
    return
  }
  func.func @transform_0(%arg0: i32) -> (i32, i32) {
    %c0_i32 = arith.constant 0 : i32
    %c0_i32_0 = arith.constant 0 : i32
    return %arg0, %c0_i32 : i32, i32
  }
  func.func @transform_1(%arg0: i32) -> (i32, i32) {
    %c0_i32 = arith.constant 0 : i32
    %c0_i32_0 = arith.constant 0 : i32
    %c0_i32_1 = arith.constant 0 : i32
    return %c0_i32, %c0_i32_0 : i32, i32
  }
  func.func @transform_2(%arg0: i32) -> (i32, i32) {
    %c0_i32 = arith.constant 0 : i32
    %c0_i32_0 = arith.constant 0 : i32
    %c0_i32_1 = arith.constant 0 : i32
    return %c0_i32, %c0_i32_0 : i32, i32
  }
  func.func @transform_3(%arg0: i32) -> (i32, i32) {
    %c0_i32 = arith.constant 0 : i32
    %c0_i32_0 = arith.constant 0 : i32
    %c0_i32_1 = arith.constant 0 : i32
    return %c0_i32, %c0_i32_0 : i32, i32
  }
  func.func @transform_4(%arg0: i32) -> (i32, i32) {
    %c0_i32 = arith.constant 0 : i32
    %c0_i32_0 = arith.constant 0 : i32
    %c0_i32_1 = arith.constant 0 : i32
    return %c0_i32, %c0_i32_0 : i32, i32
  }
  func.func @transform_5(%arg0: i32) -> (i32, i32) {
    %c0_i32 = arith.constant 0 : i32
    %c0_i32_0 = arith.constant 0 : i32
    return %arg0, %c0_i32 : i32, i32
  }
}

</mosaic_0001>

<bundles_post_ra>
// kernel: tpu_custom_call.1
= control target key start
LH: loop header
LB: loop body
LE: loop exit
PB: predicated region body
PF: predicated region fallthrough
CT: control target
= control target key end

     0   :  { %10 = vsyncpa [#allocation3], 0  ;;  %s830_s0 = inlined_call_operand.vmem [shape: f32[16,32], index: 0, kind: input, shape index: {}]   ;;  %s831_s1 = inlined_call_operand.vmem [shape: f32[32,64], index: 1, kind: input, shape index: {}]   ;;  %s832_s2 = inlined_call_operand.vmem [shape: f32[1,64], index: 2, kind: input, shape index: {}]   ;;  %s833_s3 = inlined_call_operand.vmem [shape: f32[64,32], index: 3, kind: input, shape index: {}]   ;;  %s834_s4 = inlined_call_operand.vmem [shape: f32[1,32], index: 4, kind: input, shape index: {}]   ;;  %s835_s5 = inlined_call_operand.hbm [shape: f32[16,32], index: 5, kind: output, shape index: {}]  }
   0x1   :  { %12 = vsyncpa [#allocation3 + $0x1], 0  ;;  %s686_s18 = smov 0   ;;  %s688_s19 = smov 0  }
   0x2   :  { %s690_s20 = smov 0   ;;  %s692_s21 = smov 0  }
   0x3 LB: > { %s707_s22 = sadd.s32 4294967295, %s650_s21   ;;  %s470_s23 = sadd.s32 4294967294, %s650_s21   ;;  %s650_s21 = sphi %s692_s21, %s841_s21   ;;  %s646_s20 = sphi %s690_s20, %s840_s20   ;;  %s642_s19 = sphi %s688_s19, %s839_s19   ;;  %s638_s18 = sphi %s686_s18, %s838_s18  }
   0x4   : > { %s711_s24 = sadd.s32 1, %s650_s21   ;;  %s135_s25 = sadd.s32 1, %s646_s20 }
   0x5   : > { %s132_s26 = ssub.s32 %s650_s21, %s711_s24  ;;  %p145_p0 = scmp.ne.s32.totalorder %s646_s20, %s642_s19 }
   0x6   : > { %p133_p1 = scmp.eq.s32.totalorder %s132_s26, 0  ;;  %p146_p2 = scmp.eq.s32.totalorder %s707_s22, 1 }
   0x7   : > { %p151_p3 = scmp.ne.s32.totalorder %s642_s19, %s638_s18  ;;  %p152_p4 = scmp.eq.s32.totalorder %s470_s23, 1 }
   0x8   : > { %s722_s27 = scalar_select %p133_p1, %s646_s20, %s135_s25  }
   0x9   : > { %p724_p5 = por %p146_p2, %p145_p0  ;;  %p728_p6 = por %p152_p4, %p151_p3 }
   0xa   : > { %p473_p7 = scmp.ge.s32.totalorder %s650_s21, 1  ;;  %p189_p8 = scmp.lt.s32.totalorder %s650_s21, 3 }
   0xc   : > { %p190_p9 = pnand %p473_p7, %p189_p8 }
   0xd   : > { %v221_v0 = vld [vmem:[%s831_s1] sm:$0xff] (!%p190_p9)  ;;  %v222_v1 = vld [vmem:[%s831_s1 + $0x8] sm:$0xff] (!%p190_p9)  ;;  %v223_v2 = vld [vmem:[%s831_s1 + $0x10] sm:$0xff] (!%p190_p9)  ;;  %v652_v3 = vmov (!%p190_p9), 0.0|0.0   ;;  %vm653_vm0 = vmmov (!%p190_p9), 0   ;;  %v654_v6 = vmov (!%p190_p9), 0.0  }
   0xe   : > { %193 = sbr.rel (%p190_p9) target bundleno = 470 (0x1d6), region = 40  ;;  %528 = vmatprep.subr.bf16.mxu0 (!%p190_p9), %v652_v3  ;;  %v529_v4 = vpack.c.bf16 (!%p190_p9), %v222_v1, %v221_v0  ;;  %v224_v5 = vld [vmem:[%s831_s1 + $0x18] sm:$0xff] (!%p190_p9)  ;;  %506 = vmatprep.mubr.msk.f32.mxu0 (!%p190_p9), %vm653_vm0, %v654_v6  ;;  %p216_p10 = scmp.lt.s32.totalorder (!%p190_p9), %s707_s22, 1  ;;  %v307_v7 = vld [vmem:[%s833_s3] sm:$0xff] (!%p190_p9)  ;;  %v308_v8 = vld [vmem:[%s833_s3 + $0x8] sm:$0xff] (!%p190_p9)  ;;  %vm232_vm1 = vcmask (!%p190_p9), 261120  }
   0xf   : > { %534 = vmatprep.subr.bf16.mxu1 (!%p190_p9), %v652_v3  ;;  %v535_v9 = vpack.c.bf16 (!%p190_p9), %v308_v8, %v307_v7  ;;  %v309_v10 = vld [vmem:[%s833_s3 + $0x10] sm:$0xff] (!%p190_p9)  ;;  %v310_v11 = vld [vmem:[%s833_s3 + $0x18] sm:$0xff] (!%p190_p9)  ;;  %525 = vmatprep.mubr.msk.f32.mxu1 (!%p190_p9), %vm653_vm0, %v654_v6  ;;  %v532_v12 = vpack.c.bf16 (!%p190_p9), %v224_v5, %v223_v2  ;;  %v311_v14 = vld [vmem:[%s833_s3 + $0x20] sm:$0xff] (!%p190_p9)  ;;  %vm322_vm2 = vcmask (!%p190_p9), 523264   ;;  %s213_s26 = sand.u32 (!%p190_p9), 1, %s642_s19   ;;  %s481_s8 = sshll.u32 (!%p190_p9), %s707_s22, 7 }
  0x10   : > { %530 = vmatpush3.bf16.msra.mxu0 (!%p190_p9), %v529_v4  ;;  %v538_v13 = vpack.c.bf16 (!%p190_p9), %v310_v11, %v309_v10  ;;  %v312_v15 = vld [vmem:[%s833_s3 + $0x28] sm:$0xff] (!%p190_p9)  ;;  %v313_v18 = vld [vmem:[%s833_s3 + $0x30] sm:$0xff] (!%p190_p9)  ;;  %v314_v19 = vld [vmem:[%s833_s3 + $0x38] sm:$0xff] (!%p190_p9)  ;;  %s398_s14 = scalar_lea.sflag (!%p190_p9), [#allocation3], %s213_s26 }
  0x11   : > { %531 = vmatprep.subr.bf16.mxu0 (!%p190_p9), %v652_v3  ;;  %536 = vmatpush3.bf16.msra.mxu1 (!%p190_p9), %v535_v9  ;;  %v541_v17 = vpack.c.bf16 (!%p190_p9), %v312_v15, %v311_v14  ;;  %v544_v20 = vpack.c.bf16 (!%p190_p9), %v314_v19, %v313_v18  ;;  %v476_v21 = vld [vmem:[%s832_s2] ss:$0 sm:$0xff] (!%p190_p9) }
  0x12   : > { %537 = vmatprep.subr.bf16.mxu1 (!%p190_p9), %v652_v3  ;;  %v478_v26 = vld [vmem:[%s834_s4] ss:$0 sm:$0xff] (!%p190_p9) }
  0x14   : > { %533 = vmatpush3.bf16.msra.mxu0 (!%p190_p9), %v532_v12 }
  0x15   : > { %s217_s30 = scalar_select %p216_p10, %s707_s22, 1  ;;  %539 = vmatpush3.bf16.msra.mxu1 %v538_v13 }
  0x16   : > { %540 = vmatprep.subr.bf16.mxu1 %v652_v3  ;;  %s655_s22 = smov [#allocation2]  }
  0x17   : > { %s475_s6 = sshll.u32 %s217_s30, 3  ;;  %s474_s30 = sshll.u32 %s213_s26, 3 }
  0x18   : > { %s219_s13 = scalar_lea.vmem %s830_s0, %s475_s6  ;;  %s215_s9 = scalar_lea.vmem [#allocation2], %s474_s30 }
  0x19   : > { %v220_v16 = vld [vmem:[%s219_s13] sm:$0xff]  ;;  %542 = vmatpush3.bf16.msra.mxu1 %v541_v17  ;;  %s411_s10 = sshll.u32 %s215_s9, 4  ;;  %s787_s13 = scalar_lea.hbm %s835_s5, %s481_s8  ;;  %s789_s10 = int_to_ptr.vmem [resolvable:$true] %s411_s10 }
  0x1a   : > { %507 = vmatmul.mubr.msk.f32.vlgmr.msra.gmra.mrb[0].mxu0 %vm232_vm1, %v220_v16  ;;  %543 = vmatprep.subr.bf16.mxu1 %v652_v3  ;;  %s588_s15 = scalar_lea.vmem %s789_s10, 128  ;;  %s592_s16 = sshll.u32 %s655_s22, 4  ;;  %s593_s16 = int_to_ptr.vmem [resolvable:$false] %s592_s16 }
  0x1b   : > { %p589_p11 = scmp.ne.s32.totalorder %s789_s10, %s588_s15  ;;  %s594_s17 = scalar_lea.vmem %s593_s16, 256 }
  0x1c   : > { %p595_p0 = scmp.lt.s32.totalorder %s789_s10, %s593_s16  ;;  %p596_p1 = scmp.lt.s32.totalorder %s594_s17, %s588_s15 }
  0x1d   : > { %545 = vmatpush3.bf16.msra.mxu1 %v544_v20  ;;  %p590_p12 = pnand %p589_p11, %p724_p5 }
  0x1e   : > { %p597_p2 = por %p596_p1, %p595_p0 }
  0x1f   : > { %p591_p13 = pneg %p590_p12 }
  0x21   : > { %p598_p3 = pnand %p597_p2, %p591_p13 }
  0xed   : > { %v302_v22 = vpop.f32.mrb[0].mxu0 }
  0xee   : > { %v303_v23 = vadd.f32 %v476_v21, %v302_v22  ;;  %v508_v24 = vpop.f32.mrb[1].mxu0 }
  0xf0   : > { %v306_v25 = vmax.f32 %v303_v23, 0.0 }
  0xf2   : > { %526 = vmatmul.mubr.msk.f32.vlgmr.msra.gmra.mrb[0].mxu1 %vm322_vm2, %v306_v25 }
 0x1c5   : > { %v392_v27 = vpop.f32.mrb[0].mxu1 }
 0x1c6   : > { %v393_v28 = vadd.f32 %v478_v26, %v392_v27  ;;  %v527_v29 = vpop.f32.mrb[1].mxu1 }
 0x1c8   : > { %396 = vst.msk [vmem:[%s215_s9] sm:$0xff] %vm232_vm1, %v393_v28 }
 0x1c9   : > { %601 = shalt.err (!%p598_p3)
}
 0x1ca   : > { %s602_s23 = scalar_lea.hbm %s787_s13, 128  ;;  %s606_s30 = scalar_lea.hbm %s835_s5, 256 }
 0x1cb   : > { %p603_p4 = scmp.ne.s32.totalorder %s787_s13, %s602_s23  ;;  %p607_p9 = scmp.lt.u32.totalorder %s787_s13, %s835_s5 }
 0x1cc   : > { %p608_p10 = scmp.lt.u32.totalorder %s606_s30, %s602_s23  ;;  %p610_p12 = scmp.lt.u32.totalorder %s602_s23, %s787_s13 }
 0x1cd   : > { %p604_p7 = pnand %p603_p4, %p724_p5 }
 0x1ce   : > { %p609_p11 = por %p608_p10, %p607_p9 }
 0x1cf   : > { %p605_p8 = pneg %p604_p7 }
 0x1d0   : > { %p611_p13 = por %p610_p12, %p609_p11 }
 0x1d2   : > { %p612_p0 = pnand %p611_p13, %p605_p8 }
 0x1d4   : > { %615 = shalt.err (!%p612_p0)
}
 0x1d5   : > { %546 = dma.vmem_to_hbm [thread:$0]  (%p724_p5), %s789_s10, 128, %s787_s13, %s398_s14  }
 0x1d6 PF: > { %p552_p1 = scmp.ge.s32.totalorder %s650_s21, 2  ;;  %s423_s8 = sand.u32 1, %s638_s18  }
 0x1d7   : > { %s424_s9 = scalar_lea.sflag [#allocation3], %s423_s8 }
 0x1d8   : > { %p549_p2 = pnand %p552_p1, %p728_p6 }
 0x1da   : > { %633 = dma.done.wait (!%p549_p2), %s424_s9, 128  }
 0x1db   : > { %635 = vsyncadd (!%p549_p2), %s424_s9, 4294967168  ;;  %p15_p3 = scmp.ge.s32.totalorder %s711_s24, 4   ;;  %s838_s18 = smov %s642_s19 }
 0x1dc   : > { %s839_s19 = smov %s646_s20  ;;  %s840_s20 = smov %s722_s27 }
 0x1dd   : > { %s841_s21 = smov %s711_s24  ;;  %17 = sbr.rel (!%p15_p3) target bundleno = 3 (0x3), region = 75 }
 0x1e4   :  { %429 = vsyncpa [#allocation3], 1 }
 0x1e5   :  { %431 = vsyncpa [#allocation3 + $0x1], 1 }

</bundles_post_ra>
